<compile_context>
chip_gen: v5e
topology: v5e:2x2
jax: 0.10.0
libtpu: 0.0.40
codegen_flags: <defaults>
</compile_context>

<pallas_src>
import jax
import jax.numpy as jnp
from jax.experimental import pallas as pl
from jax.experimental.pallas import tpu as pltpu

EPS = 1e-5
LANES = 128


def _round_up(x, m):
    return (x + m - 1) // m * m


def cnn_block_kernel(x_ref,   # (N, L+2*HALO, CP)  bf16  padded channel-last input
                     w1_ref,  # (K*CP, CP)         bf16  im2col conv1 weights
                     w2_ref,  # (K*CP, CP)         bf16  im2col conv2 weights
                     ws_ref,  # (CP, CP)           bf16  1x1 shortcut weights
                     p_ref,   # (6, CP)            f32   rows: g1,be1,g2,be2,gs,bes
                     o_ref,   # (N*L, CP)          f32   lane-dense output
                     hbuf):   # (N, L+2*HALO, CP)  bf16  scratch: padded hidden activation
    N = x_ref.shape[0]
    CP = o_ref.shape[-1]
    M = o_ref.shape[0]
    L = M // N
    HALO = (x_ref.shape[1] - L) // 2          # sublane-aligned halo (>= PAD, multiple of 8)
    K = w1_ref.shape[0] // CP
    PAD = (K - 1) // 2
    inv_cnt = 1.0 / float(M)

    g1, be1 = p_ref[0:1, :], p_ref[1:2, :]
    g2, be2 = p_ref[2:3, :], p_ref[3:4, :]
    gs, bes = p_ref[4:5, :], p_ref[5:6, :]

    def taps(src, center=None):
        # (M, CP) bf16 shifted tap slices of a zero-padded (N, L+2*HALO, CP) value.
        parts = []
        for k in range(K):                    # static unroll over taps
            if k == PAD and center is not None:
                parts.append(center)          # reuse the in-register center tap
            else:
                s = HALO - PAD + k
                parts.append(src[:, s:s + L, :].reshape(M, CP))
        return parts

    def batchnorm(y, gamma, beta):
        # Training-mode BN over the (N, L) rows: centered biased variance (stable),
        # eps=1e-5, applied to the already-centered tensor: d * scale + beta.
        mean = y.sum(axis=0, keepdims=True) * inv_cnt          # (1, CP)
        d = y - mean
        var = (d * d).sum(axis=0, keepdims=True) * inv_cnt
        scale = gamma * jax.lax.rsqrt(var + EPS)
        return d * scale + beta

    # conv1 (one K-deep im2col MXU matmul) and the 1x1 shortcut share the center tap.
    x_parts = taps(x_ref[...])
    x_center = x_parts[PAD]
    h1 = jnp.dot(jnp.concatenate(x_parts, axis=-1), w1_ref[...],
                 preferred_element_type=jnp.float32)
    sc = jnp.dot(x_center, ws_ref[...], preferred_element_type=jnp.float32)
    # Conv biases are intentionally omitted: a per-channel bias added before
    # training-mode BN is cancelled exactly by the mean subtraction.

    # out = relu(bn1(conv1(x)))
    h1 = jnp.maximum(batchnorm(h1, g1, be1), 0.0)
    h1_bf = h1.astype(jnp.bfloat16)

    # Re-pad the hidden activation in persistent bf16 VMEM scratch: only the halo slabs
    # are zeroed; the interior is a single full-lane, sublane-aligned store.
    zhalo = jnp.zeros((N, HALO, CP), jnp.bfloat16)
    hbuf[:, :HALO, :] = zhalo
    hbuf[:, HALO + L:, :] = zhalo
    hbuf[:, HALO:HALO + L, :] = h1_bf.reshape(N, L, CP)

    # conv2: side taps from scratch, center tap directly from the in-register h1.
    h_parts = taps(hbuf[...], center=h1_bf)
    h2 = jnp.dot(jnp.concatenate(h_parts, axis=-1), w2_ref[...],
                 preferred_element_type=jnp.float32)

    # out = relu(bn2(conv2(out)) + bn_s(conv1x1(x)))
    h2 = batchnorm(h2, g2, be2)
    sc = batchnorm(sc, gs, bes)
    o_ref[...] = jnp.maximum(h2 + sc, 0.0)


@jax.jit
def cnn_block_pallas(x, params):
    """x: (N, Cin, L) float32 (PyTorch NCL). Returns (N, Cout, L) float32."""
    N, Cin, L = x.shape
    Cout, _, K = params["w1"].shape
    pad = (K - 1) // 2
    assert K == 2 * pad + 1, "kernel assumes the module-default 'same' conv (stride=1)"
    halo = _round_up(max(pad, 1), 8)                 # sublane-aligned halo
    CP = _round_up(max(Cin, Cout), LANES)            # lane-dense channel padding

    # NCL -> NLC transpose fused with channel pad to CP, halo pad and the bf16 cast:
    # one boundary layout op producing a lane-dense, MXU-ready operand (no masked
    # in-kernel stores, no input staging scratch).
    x_nlc = jnp.transpose(x, (0, 2, 1)).astype(jnp.bfloat16)
    lpad = L + 2 * halo
    x_pad = jnp.zeros((N, lpad, CP), jnp.bfloat16).at[:, halo:halo + L, :Cin].set(x_nlc)

    def pack_w3(w):
        # torch Conv1d (O, I, K) -> (K*CP, CP) bf16 im2col weights, [k*CP + cin, cout]
        o, i, k = w.shape
        wt = jnp.transpose(w, (2, 1, 0)).astype(jnp.bfloat16)                # (K, I, O)
        return jnp.zeros((k, CP, CP), jnp.bfloat16).at[:, :i, :o].set(wt).reshape(k * CP, CP)

    def pack_w1(w):
        o, i, _ = w.shape
        wt = jnp.transpose(w[:, :, 0]).astype(jnp.bfloat16)                  # (I, O)
        return jnp.zeros((CP, CP), jnp.bfloat16).at[:i, :o].set(wt)

    def row(v, fill):
        return jnp.full((CP,), fill, jnp.float32).at[:v.shape[0]].set(v.astype(jnp.float32))

    pmat = jnp.stack([row(params["g1"], 1.), row(params["be1"], 0.),
                      row(params["g2"], 1.), row(params["be2"], 0.),
                      row(params["gs"], 1.), row(params["bes"], 0.)])

    # Explicit scoped-VMEM budget derived from the actual buffer sizes (the 16/32 MiB
    # defaults would otherwise cap the whole-in-VMEM design well below physical VMEM);
    # capped at 64 MiB so it never exceeds physical VMEM on any generation (incl. v7x).
    in_bytes = N * lpad * CP * 2 + 2 * (K * CP * CP * 2) + CP * CP * 2 + 6 * CP * 4
    out_bytes = N * L * CP * 4
    scratch_bytes = N * lpad * CP * 2
    vmem_limit = int(min(3 * (in_bytes + out_bytes + scratch_bytes) + (8 << 20), 64 << 20))

    vmem = pl.BlockSpec(memory_space=pltpu.MemorySpace.VMEM)
    out2d = pl.pallas_call(
        cnn_block_kernel,
        out_shape=jax.ShapeDtypeStruct((N * L, CP), jnp.float32),
        in_specs=[vmem] * 5,
        out_specs=vmem,
        scratch_shapes=[pltpu.VMEM((N, lpad, CP), jnp.bfloat16)],
        compiler_params=pltpu.CompilerParams(vmem_limit_bytes=vmem_limit),
    )(x_pad, pack_w3(params["w1"]), pack_w3(params["w2"]), pack_w1(params["ws"]), pmat)

    out = out2d.reshape(N, L, CP)[:, :, :Cout]       # drop lane padding
    return jnp.transpose(out, (0, 2, 1))             # back to PyTorch NCL


def cnn_block_reference(x, p):
    """Pure-JAX reference (NCL layout), same forward semantics as the PyTorch module.
    Conv operands are rounded to bf16 with f32 accumulation, mirroring the kernel's MXU
    policy (and XLA:TPU default matmul precision); all BN/elementwise math is f32."""
    def conv1d(x, w, b, padding):
        y = jax.lax.conv_general_dilated(
            x.astype(jnp.bfloat16), w.astype(jnp.bfloat16),
            window_strides=(1,), padding=[(padding, padding)],
            dimension_numbers=("NCH", "OIH", "NCH"),
            preferred_element_type=jnp.float32)
        return y + b[None, :, None]

    def bn(x, gamma, beta):
        mean = x.mean(axis=(0, 2), keepdims=True)
        var = ((x - mean) ** 2).mean(axis=(0, 2), keepdims=True)   # biased, training mode
        xn = (x - mean) * jax.lax.rsqrt(var + EPS)
        return xn * gamma[None, :, None] + beta[None, :, None]

    h = jax.nn.relu(bn(conv1d(x, p["w1"], p["b1"], 1), p["g1"], p["be1"]))
    h = bn(conv1d(h, p["w2"], p["b2"], 1), p["g2"], p["be2"])
    s = bn(conv1d(x, p["ws"], p["bs"], 0), p["gs"], p["bes"])
    return jax.nn.relu(h + s)


def init_params(key, in_channels, out_channels, kernel=3):
    ks = jax.random.split(key, 6)
    f32 = jnp.float32
    return {
        "w1": 0.1 * jax.random.normal(ks[0], (out_channels, in_channels, kernel), f32),
        "b1": 0.1 * jax.random.normal(ks[1], (out_channels,), f32),
        "g1": jnp.ones((out_channels,), f32),
        "be1": jnp.zeros((out_channels,), f32),
        "w2": 0.1 * jax.random.normal(ks[2], (out_channels, out_channels, kernel), f32),
        "b2": 0.1 * jax.random.normal(ks[3], (out_channels,), f32),
        "g2": jnp.ones((out_channels,), f32),
        "be2": jnp.zeros((out_channels,), f32),
        "ws": 0.1 * jax.random.normal(ks[4], (out_channels, in_channels, 1), f32),
        "bs": 0.1 * jax.random.normal(ks[5], (out_channels,), f32),
        "gs": jnp.ones((out_channels,), f32),
        "bes": jnp.zeros((out_channels,), f32),
    }


if __name__ == "__main__":
    N, Cin, Cout, L = 2, 4, 8, 16
    key = jax.random.PRNGKey(0)
    kx, kp = jax.random.split(key)
    x = jax.random.normal(kx, (N, Cin, L), jnp.float32)     # PyTorch NCL input
    params = init_params(kp, Cin, Cout, kernel=3)

    out = jax.block_until_ready(cnn_block_pallas(x, params))
    ref = jax.block_until_ready(cnn_block_reference(x, params))

    assert out.shape == (N, Cout, L)
    err = float(jnp.max(jnp.abs(out - ref)))
    assert jnp.allclose(out, ref, atol=2e-3, rtol=2e-3), f"max abs err {err}"
    print("KERNEL_OK")
</pallas_src>

<mosaic_0001>
module attributes {stable_mosaic.version = 11 : i64} {
  func.func @cnn_block_kernel(%arg0: memref<2x32x128xbf16, #tpu.memory_space<vmem>>, %arg1: memref<384x128xbf16, #tpu.memory_space<vmem>>, %arg2: memref<384x128xbf16, #tpu.memory_space<vmem>>, %arg3: memref<128x128xbf16, #tpu.memory_space<vmem>>, %arg4: memref<6x128xf32, #tpu.memory_space<vmem>>, %arg5: memref<32x128xf32, #tpu.memory_space<vmem>>, %arg6: memref<2x32x128xbf16, #tpu.memory_space<vmem>>) attributes {dimension_semantics = [], scalar_prefetch = 0 : i64, scratch_operands = 1 : i64, tpu.core_type = #tpu.core_type<tc>} {
    %c0 = arith.constant 0 : index
    %c0_0 = arith.constant 0 : index
    %0 = vector.load %arg4[%c0, %c0_0] : memref<6x128xf32, #tpu.memory_space<vmem>>, vector<1x128xf32>
    %c1 = arith.constant 1 : index
    %c0_1 = arith.constant 0 : index
    %1 = vector.load %arg4[%c1, %c0_1] : memref<6x128xf32, #tpu.memory_space<vmem>>, vector<1x128xf32>
    %c2 = arith.constant 2 : index
    %c0_2 = arith.constant 0 : index
    %2 = vector.load %arg4[%c2, %c0_2] : memref<6x128xf32, #tpu.memory_space<vmem>>, vector<1x128xf32>
    %c3 = arith.constant 3 : index
    %c0_3 = arith.constant 0 : index
    %3 = vector.load %arg4[%c3, %c0_3] : memref<6x128xf32, #tpu.memory_space<vmem>>, vector<1x128xf32>
    %c4 = arith.constant 4 : index
    %c0_4 = arith.constant 0 : index
    %4 = vector.load %arg4[%c4, %c0_4] : memref<6x128xf32, #tpu.memory_space<vmem>>, vector<1x128xf32>
    %c5 = arith.constant 5 : index
    %c0_5 = arith.constant 0 : index
    %5 = vector.load %arg4[%c5, %c0_5] : memref<6x128xf32, #tpu.memory_space<vmem>>, vector<1x128xf32>
    %c0_6 = arith.constant 0 : index
    %c0_7 = arith.constant 0 : index
    %c0_8 = arith.constant 0 : index
    %6 = vector.load %arg0[%c0_6, %c0_7, %c0_8] : memref<2x32x128xbf16, #tpu.memory_space<vmem>>, vector<2x32x128xbf16>
    %7 = vector.extract_strided_slice %6 {offsets = [0, 7, 0], sizes = [2, 16, 128], strides = [1, 1, 1]} : vector<2x32x128xbf16> to vector<2x16x128xbf16>
    %8 = vector.shape_cast %7 : vector<2x16x128xbf16> to vector<32x128xbf16>
    %9 = vector.extract_strided_slice %6 {offsets = [0, 8, 0], sizes = [2, 16, 128], strides = [1, 1, 1]} : vector<2x32x128xbf16> to vector<2x16x128xbf16>
    %10 = vector.shape_cast %9 : vector<2x16x128xbf16> to vector<32x128xbf16>
    %11 = vector.extract_strided_slice %6 {offsets = [0, 9, 0], sizes = [2, 16, 128], strides = [1, 1, 1]} : vector<2x32x128xbf16> to vector<2x16x128xbf16>
    %12 = vector.shape_cast %11 : vector<2x16x128xbf16> to vector<32x128xbf16>
    %13 = tpu.concatenate %8, %10, %12 in 1 : vector<32x128xbf16>, vector<32x128xbf16>, vector<32x128xbf16> -> vector<32x384xbf16>
    %c0_9 = arith.constant 0 : index
    %c0_10 = arith.constant 0 : index
    %14 = vector.load %arg1[%c0_9, %c0_10] : memref<384x128xbf16, #tpu.memory_space<vmem>>, vector<384x128xbf16>
    %cst = arith.constant dense<0.000000e+00> : vector<32x128xf32>
    %15 = tpu.matmul %13, %14, %cst {dimension_numbers = #tpu.dot_dimension_numbers<[1], [0], [0], [1], [0, 0, 1, 1], [], []>} : vector<32x384xbf16>, vector<384x128xbf16>, vector<32x128xf32> -> vector<32x128xf32>
    %c0_11 = arith.constant 0 : index
    %c0_12 = arith.constant 0 : index
    %16 = vector.load %arg3[%c0_11, %c0_12] : memref<128x128xbf16, #tpu.memory_space<vmem>>, vector<128x128xbf16>
    %cst_13 = arith.constant dense<0.000000e+00> : vector<32x128xf32>
    %17 = tpu.matmul %10, %16, %cst_13 {dimension_numbers = #tpu.dot_dimension_numbers<[1], [0], [0], [1], [0, 0, 1, 1], [], []>} : vector<32x128xbf16>, vector<128x128xbf16>, vector<32x128xf32> -> vector<32x128xf32>
    %cst_14 = arith.constant dense<0.000000e+00> : vector<128xf32>
    %18 = vector.multi_reduction <add>, %15, %cst_14 [0] : vector<32x128xf32> to vector<128xf32>
    %19 = vector.shape_cast %18 : vector<128xf32> to vector<1x128xf32>
    %cst_15 = arith.constant 3.125000e-02 : f32
    %20 = vector.broadcast %cst_15 : f32 to vector<1x128xf32>
    %21 = arith.mulf %19, %20 : vector<1x128xf32>
    %22 = vector.broadcast %21 : vector<1x128xf32> to vector<32x128xf32>
    %23 = arith.subf %15, %22 : vector<32x128xf32>
    %24 = arith.mulf %23, %23 : vector<32x128xf32>
    %cst_16 = arith.constant dense<0.000000e+00> : vector<128xf32>
    %25 = vector.multi_reduction <add>, %24, %cst_16 [0] : vector<32x128xf32> to vector<128xf32>
    %26 = vector.shape_cast %25 : vector<128xf32> to vector<1x128xf32>
    %cst_17 = arith.constant 3.125000e-02 : f32
    %27 = vector.broadcast %cst_17 : f32 to vector<1x128xf32>
    %28 = arith.mulf %26, %27 : vector<1x128xf32>
    %cst_18 = arith.constant 9.99999974E-6 : f32
    %29 = vector.broadcast %cst_18 : f32 to vector<1x128xf32>
    %30 = arith.addf %28, %29 : vector<1x128xf32>
    %31 = math.rsqrt %30 : vector<1x128xf32>
    %32 = arith.mulf %0, %31 : vector<1x128xf32>
    %33 = vector.broadcast %32 : vector<1x128xf32> to vector<32x128xf32>
    %34 = arith.mulf %23, %33 : vector<32x128xf32>
    %35 = vector.broadcast %1 : vector<1x128xf32> to vector<32x128xf32>
    %36 = arith.addf %34, %35 : vector<32x128xf32>
    %cst_19 = arith.constant 0.000000e+00 : f32
    %37 = vector.broadcast %cst_19 : f32 to vector<32x128xf32>
    %38 = arith.maximumf %36, %37 : vector<32x128xf32>
    %39 = arith.truncf %38 : vector<32x128xf32> to vector<32x128xbf16>
    %cst_20 = arith.constant 0.000000e+00 : bf16
    %40 = vector.broadcast %cst_20 : bf16 to vector<2x8x128xbf16>
    %c0_21 = arith.constant 0 : index
    %c0_22 = arith.constant 0 : index
    %c0_23 = arith.constant 0 : index
    %41 = vector.load %arg6[%c0_21, %c0_22, %c0_23] : memref<2x32x128xbf16, #tpu.memory_space<vmem>>, vector<2x8x128xbf16>
    tpu.vector_store %arg6[%c0_21, %c0_22, %c0_23], %40 {strides = array<i32>} : memref<2x32x128xbf16, #tpu.memory_space<vmem>>, vector<2x8x128xbf16>,
    %c0_24 = arith.constant 0 : index
    %c24 = arith.constant 24 : index
    %c0_25 = arith.constant 0 : index
    %42 = vector.load %arg6[%c0_24, %c24, %c0_25] : memref<2x32x128xbf16, #tpu.memory_space<vmem>>, vector<2x8x128xbf16>
    tpu.vector_store %arg6[%c0_24, %c24, %c0_25], %40 {strides = array<i32>} : memref<2x32x128xbf16, #tpu.memory_space<vmem>>, vector<2x8x128xbf16>,
    %43 = vector.shape_cast %39 : vector<32x128xbf16> to vector<2x16x128xbf16>
    %c0_26 = arith.constant 0 : index
    %c8 = arith.constant 8 : index
    %c0_27 = arith.constant 0 : index
    %44 = vector.load %arg6[%c0_26, %c8, %c0_27] : memref<2x32x128xbf16, #tpu.memory_space<vmem>>, vector<2x16x128xbf16>
    tpu.vector_store %arg6[%c0_26, %c8, %c0_27], %43 {strides = array<i32>} : memref<2x32x128xbf16, #tpu.memory_space<vmem>>, vector<2x16x128xbf16>,
    %c0_28 = arith.constant 0 : index
    %c0_29 = arith.constant 0 : index
    %c0_30 = arith.constant 0 : index
    %45 = vector.load %arg6[%c0_28, %c0_29, %c0_30] : memref<2x32x128xbf16, #tpu.memory_space<vmem>>, vector<2x32x128xbf16>
    %46 = vector.extract_strided_slice %45 {offsets = [0, 7, 0], sizes = [2, 16, 128], strides = [1, 1, 1]} : vector<2x32x128xbf16> to vector<2x16x128xbf16>
    %47 = vector.shape_cast %46 : vector<2x16x128xbf16> to vector<32x128xbf16>
    %48 = vector.extract_strided_slice %45 {offsets = [0, 9, 0], sizes = [2, 16, 128], strides = [1, 1, 1]} : vector<2x32x128xbf16> to vector<2x16x128xbf16>
    %49 = vector.shape_cast %48 : vector<2x16x128xbf16> to vector<32x128xbf16>
    %50 = tpu.concatenate %47, %39, %49 in 1 : vector<32x128xbf16>, vector<32x128xbf16>, vector<32x128xbf16> -> vector<32x384xbf16>
    %c0_31 = arith.constant 0 : index
    %c0_32 = arith.constant 0 : index
    %51 = vector.load %arg2[%c0_31, %c0_32] : memref<384x128xbf16, #tpu.memory_space<vmem>>, vector<384x128xbf16>
    %cst_33 = arith.constant dense<0.000000e+00> : vector<32x128xf32>
    %52 = tpu.matmul %50, %51, %cst_33 {dimension_numbers = #tpu.dot_dimension_numbers<[1], [0], [0], [1], [0, 0, 1, 1], [], []>} : vector<32x384xbf16>, vector<384x128xbf16>, vector<32x128xf32> -> vector<32x128xf32>
    %cst_34 = arith.constant dense<0.000000e+00> : vector<128xf32>
    %53 = vector.multi_reduction <add>, %52, %cst_34 [0] : vector<32x128xf32> to vector<128xf32>
    %54 = vector.shape_cast %53 : vector<128xf32> to vector<1x128xf32>
    %cst_35 = arith.constant 3.125000e-02 : f32
    %55 = vector.broadcast %cst_35 : f32 to vector<1x128xf32>
    %56 = arith.mulf %54, %55 : vector<1x128xf32>
    %57 = vector.broadcast %56 : vector<1x128xf32> to vector<32x128xf32>
    %58 = arith.subf %52, %57 : vector<32x128xf32>
    %59 = arith.mulf %58, %58 : vector<32x128xf32>
    %cst_36 = arith.constant dense<0.000000e+00> : vector<128xf32>
    %60 = vector.multi_reduction <add>, %59, %cst_36 [0] : vector<32x128xf32> to vector<128xf32>
    %61 = vector.shape_cast %60 : vector<128xf32> to vector<1x128xf32>
    %cst_37 = arith.constant 3.125000e-02 : f32
    %62 = vector.broadcast %cst_37 : f32 to vector<1x128xf32>
    %63 = arith.mulf %61, %62 : vector<1x128xf32>
    %cst_38 = arith.constant 9.99999974E-6 : f32
    %64 = vector.broadcast %cst_38 : f32 to vector<1x128xf32>
    %65 = arith.addf %63, %64 : vector<1x128xf32>
    %66 = math.rsqrt %65 : vector<1x128xf32>
    %67 = arith.mulf %2, %66 : vector<1x128xf32>
    %68 = vector.broadcast %67 : vector<1x128xf32> to vector<32x128xf32>
    %69 = arith.mulf %58, %68 : vector<32x128xf32>
    %70 = vector.broadcast %3 : vector<1x128xf32> to vector<32x128xf32>
    %71 = arith.addf %69, %70 : vector<32x128xf32>
    %cst_39 = arith.constant dense<0.000000e+00> : vector<128xf32>
    %72 = vector.multi_reduction <add>, %17, %cst_39 [0] : vector<32x128xf32> to vector<128xf32>
    %73 = vector.shape_cast %72 : vector<128xf32> to vector<1x128xf32>
    %cst_40 = arith.constant 3.125000e-02 : f32
    %74 = vector.broadcast %cst_40 : f32 to vector<1x128xf32>
    %75 = arith.mulf %73, %74 : vector<1x128xf32>
    %76 = vector.broadcast %75 : vector<1x128xf32> to vector<32x128xf32>
    %77 = arith.subf %17, %76 : vector<32x128xf32>
    %78 = arith.mulf %77, %77 : vector<32x128xf32>
    %cst_41 = arith.constant dense<0.000000e+00> : vector<128xf32>
    %79 = vector.multi_reduction <add>, %78, %cst_41 [0] : vector<32x128xf32> to vector<128xf32>
    %80 = vector.shape_cast %79 : vector<128xf32> to vector<1x128xf32>
    %cst_42 = arith.constant 3.125000e-02 : f32
    %81 = vector.broadcast %cst_42 : f32 to vector<1x128xf32>
    %82 = arith.mulf %80, %81 : vector<1x128xf32>
    %cst_43 = arith.constant 9.99999974E-6 : f32
    %83 = vector.broadcast %cst_43 : f32 to vector<1x128xf32>
    %84 = arith.addf %82, %83 : vector<1x128xf32>
    %85 = math.rsqrt %84 : vector<1x128xf32>
    %86 = arith.mulf %4, %85 : vector<1x128xf32>
    %87 = vector.broadcast %86 : vector<1x128xf32> to vector<32x128xf32>
    %88 = arith.mulf %77, %87 : vector<32x128xf32>
    %89 = vector.broadcast %5 : vector<1x128xf32> to vector<32x128xf32>
    %90 = arith.addf %88, %89 : vector<32x128xf32>
    %91 = arith.addf %71, %90 : vector<32x128xf32>
    %cst_44 = arith.constant 0.000000e+00 : f32
    %92 = vector.broadcast %cst_44 : f32 to vector<32x128xf32>
    %93 = arith.maximumf %91, %92 : vector<32x128xf32>
    %c0_45 = arith.constant 0 : index
    %c0_46 = arith.constant 0 : index
    %94 = vector.load %arg5[%c0_45, %c0_46] : memref<32x128xf32, #tpu.memory_space<vmem>>, vector<32x128xf32>
    tpu.vector_store %arg5[%c0_45, %c0_46], %93 {strides = array<i32>} : memref<32x128xf32, #tpu.memory_space<vmem>>, vector<32x128xf32>,
    return
  }
}

</mosaic_0001>

<bundles_post_ra>
// kernel: cnn_block_pallas.1
= control target key start
LH: loop header
LB: loop body
LE: loop exit
PB: predicated region body
PF: predicated region fallthrough
CT: control target
= control target key end

     0   :  { %vm35_vm0 = vsmask.f32 256  ;;  %vm36_vm1 = vsmask.f32 4368  ;;  %vm82_vm2 = vsmask.f32 3328  ;;  %s1666_s1 = inlined_call_operand.vmem [shape: bf16[384,128], index: 1, kind: input, shape index: {}]   ;;  %s1667_s0 = inlined_call_operand.vmem [shape: bf16[2,32,128], index: 0, kind: input, shape index: {}]   ;;  %s1668_s3 = inlined_call_operand.vmem [shape: bf16[128,128], index: 3, kind: input, shape index: {}]   ;;  %s1669_s4 = inlined_call_operand.vmem [shape: f32[6,128], index: 4, kind: input, shape index: {}]   ;;  %s1670_s2 = inlined_call_operand.vmem [shape: bf16[384,128], index: 2, kind: input, shape index: {}]   ;;  %s1671_s5 = inlined_call_operand.vmem [shape: f32[32,128], index: 5, kind: output, shape index: {}]  }
   0x1   :  { %v1257_v0 = vld [vmem:[%s1666_s1 + $0x38] sm:$0xff]  ;;  %v1256_v3 = vld [vmem:[%s1666_s1 + $0x30] sm:$0xff]  ;;  %v1255_v6 = vld [vmem:[%s1666_s1 + $0x28] sm:$0xff]  ;;  %vm83_vm3 = vsmask.f32 7440 }
   0x2   :  { %v1265_v1 = vld [vmem:[%s1666_s1 + $0x78] sm:$0xff]  ;;  %333 = vmatpush.bf16.msra.mxu0 %v1257_v0  ;;  %v1264_v4 = vld [vmem:[%s1666_s1 + $0x70] sm:$0xff]  ;;  %v1263_v7 = vld [vmem:[%s1666_s1 + $0x68] sm:$0xff] }
   0x3   :  { %v1273_v2 = vld [vmem:[%s1666_s1 + $0xb8] sm:$0xff]  ;;  %352 = vmatpush.bf16.msra.mxu1 %v1265_v1  ;;  %v1272_v5 = vld [vmem:[%s1666_s1 + $0xb0] sm:$0xff]  ;;  %v1271_v8 = vld [vmem:[%s1666_s1 + $0xa8] sm:$0xff] }
   0x4   :  { %371 = vmatpush.bf16.msra.mxu2 %v1273_v2  ;;  %v28_v9 = vld [vmem:[%s1667_s0 + $0x4] sm:$0xf]  ;;  %v29_v10 = vld [vmem:[%s1667_s0 + $0x8] sm:$0xf]  ;;  %v27_v18 = vld [vmem:[%s1667_s0] sm:$0xf] }
   0x5   :  { %v44_v11 = vshrl.u32 %v28_v9, 16  ;;  %v47_v12 = vshll.u32 %v28_v9, 16  ;;  %v53_v13 = vshrl.u32 %v29_v10, 16  ;;  %v1254_v14 = vld [vmem:[%s1666_s1 + $0x20] sm:$0xff]  ;;  %v56_v16 = vshll.u32 %v29_v10, 16  ;;  %v1253_v24 = vld [vmem:[%s1666_s1 + $0x18] sm:$0xff]  ;;  %vm1425_vm4 = vmor %vm35_vm0, %vm36_vm1 }
   0x6   :  { %334 = vmatpush.bf16.msra.mxu0 %v1256_v3  ;;  %v1262_v15 = vld [vmem:[%s1666_s1 + $0x60] sm:$0xff]  ;;  %v30_v20 = vld [vmem:[%s1667_s0 + $0xc] sm:$0xf]  ;;  %v1261_v25 = vld [vmem:[%s1666_s1 + $0x58] sm:$0xff]  ;;  %v39_v26 = vshrl.u32 %v27_v18, 16 }
   0x7   :  { %353 = vmatpush.bf16.msra.mxu1 %v1264_v4  ;;  %v1270_v17 = vld [vmem:[%s1666_s1 + $0xa0] sm:$0xff]  ;;  %v85_v19 = vrot.slane %v44_v11, 4  ;;  %v86_v21 = vrot.slane %v47_v12, 5  ;;  %v89_v22 = vrot.slane %v56_v16, 5  ;;  %v91_v23 = vrot.slane %v53_v13, 4  ;;  %v1269_v29 = vld [vmem:[%s1666_s1 + $0x98] sm:$0xff]  ;;  %vm1434_vm5 = vmor %vm82_vm2, %vm83_vm3 }
   0x8   :  { %372 = vmatpush.bf16.msra.mxu2 %v1272_v5  ;;  %v46_v27 = vrot.slane %v44_v11, 7  ;;  %v55_v28 = vrot.slane %v53_v13, 7  ;;  %v95_v32 = vshll.u32 %v30_v20, 16  ;;  %v1252_v33 = vld [vmem:[%s1666_s1 + $0x10] sm:$0xff]  ;;  %v1012_v35 = vrot.slane %v39_v26, 11  ;;  %v1281_v39 = vld [vmem:[%s1668_s3 + $0x38] sm:$0xff] }
   0x9   :  { %v87_v30 = vor.u32 %v86_v21, %v85_v19  ;;  %v92_v31 = vor.u32 %v91_v23, %v89_v22  ;;  %v1260_v34 = vld [vmem:[%s1666_s1 + $0x50] sm:$0xff]  ;;  %v33_v47 = vld [vmem:[%s1667_s0 + $0x18] sm:$0xf]  ;;  %454 = vmatpush.bf16.msra.mxu3 %v1281_v39  ;;  %v1251_v49 = vld [vmem:[%s1666_s1 + $0x8] sm:$0xff] }
   0xa   :  { %335 = vmatpush.bf16.msra.mxu0 %v1255_v6  ;;  %v49_v36 = vor.u32 %v47_v12, %v46_v27  ;;  %v51_v37 = vrot.slane %v46_v27, 4  ;;  %v58_v38 = vor.u32 %v56_v16, %v55_v28  ;;  %v1268_v40 = vld [vmem:[%s1666_s1 + $0x90] sm:$0xff]  ;;  %v97_v44 = vrot.slane %v95_v32, 5  ;;  %v1259_v50 = vld [vmem:[%s1666_s1 + $0x48] sm:$0xff]  ;;  %v1250_v63 = vld [vmem:[%s1666_s1] sm:$0xff] }
   0xb   :  { %354 = vmatpush.bf16.msra.mxu1 %v1263_v7  ;;  %v88_v42 = vrot.slane %v87_v30, 4  ;;  %v93_v43 = vrot.slane %v92_v31, 4  ;;  %v32_v45 = vld [vmem:[%s1667_s0 + $0x14] sm:$0xf]  ;;  %v1267_v55 = vld [vmem:[%s1666_s1 + $0x88] sm:$0xff]  ;;  %v75_v58 = vshrl.u32 %v33_v47, 16 }
   0xc   :  { %373 = vmatpush.bf16.msra.mxu2 %v1271_v8  ;;  %v1280_v48 = vld [vmem:[%s1668_s3 + $0x30] sm:$0xff]  ;;  %v50_v51 = vsel %vm1425_vm4, %v1012_v35, %v49_v36  ;;  %v59_v52 = vsel %vm1425_vm4, %v51_v37, %v58_v38  ;;  %v66_v53 = vshrl.u32 %v32_v45, 16  ;;  %v69_v54 = vshll.u32 %v32_v45, 16  ;;  %v1279_v60 = vld [vmem:[%s1668_s3 + $0x28] sm:$0xff]  ;;  %v1258_v0 = vld [vmem:[%s1666_s1 + $0x40] sm:$0xff] }
   0xd   :  { %v90_v56 = vsel %vm1434_vm5, %v88_v42, %v89_v22  ;;  %v98_v57 = vsel %vm1434_vm5, %v93_v43, %v97_v44  ;;  %v78_v59 = vshll.u32 %v33_v47, 16  ;;  %455 = vmatpush.bf16.msra.mxu3 %v1280_v48  ;;  %v113_v61 = vunpack.c.l.b16 %v50_v51  ;;  %v1266_v1 = vld [vmem:[%s1666_s1 + $0x80] sm:$0xff]  ;;  %v31_v4 = vld [vmem:[%s1667_s0 + $0x10] sm:$0xf]  ;;  %v34_v9 = vld [vmem:[%s1667_s0 + $0x1c] sm:$0xf] }
   0xe   :  { %336 = vmatpush.bf16.msra.mxu0 %v1254_v14  ;;  %v114_v62 = vunpack.c.l.b16 %v59_v52  ;;  %v133_v2 = vunpack.c.l.b16 %v90_v56  ;;  %v134_v3 = vunpack.c.l.b16 %v98_v57  ;;  %v99_v5 = vrot.slane %v66_v53, 4  ;;  %v1248_v11 = vld [vmem:[%s1667_s0 + $0x4] sm:$0xff]  ;;  %v1249_v35 = vld [vmem:[%s1667_s0 + $0x14] sm:$0xff] }
   0xf   :  { %355 = vmatpush.bf16.msra.mxu1 %v1262_v15  ;;  %v100_v6 = vrot.slane %v69_v54, 5  ;;  %v103_v7 = vrot.slane %v78_v59, 5  ;;  %v105_v8 = vrot.slane %v75_v58, 4  ;;  %v61_v13 = vshrl.u32 %v31_v4, 16  ;;  %v1278_v37 = vld [vmem:[%s1668_s3 + $0x20] sm:$0xff]  ;;  %v1277_v38 = vld [vmem:[%s1668_s3 + $0x18] sm:$0xff] }
  0x10   :  { %374 = vmatpush.bf16.msra.mxu2 %v1270_v17  ;;  %v117_v10 = vpack.c.b16 %v114_v62, %v113_v61  ;;  %v137_v12 = vpack.c.b16 %v134_v3, %v133_v2  ;;  %v68_v14 = vrot.slane %v66_v53, 7  ;;  %v77_v15 = vrot.slane %v75_v58, 7  ;;  %v1276_v39 = vld [vmem:[%s1668_s3 + $0x10] sm:$0xff]  ;;  %v1274_v42 = vld [vmem:[%s1668_s3] sm:$0xff] }
  0x11   :  { %456 = vmatpush.bf16.msra.mxu3 %v1279_v60  ;;  %v101_v16 = vor.u32 %v100_v6, %v99_v5  ;;  %v106_v17 = vor.u32 %v105_v8, %v103_v7  ;;  %v109_v18 = vshll.u32 %v34_v9, 16  ;;  %v1013_v19 = vrot.slane %v61_v13, 11  ;;  %v1297_v9 = vld [vmem:[%s1670_s2 + $0x78] sm:$0xff] }
  0x12   :  { %337 = vmatpush.bf16.msra.mxu0 %v1253_v24  ;;  %v71_v20 = vor.u32 %v69_v54, %v68_v14  ;;  %v73_v21 = vrot.slane %v68_v14, 4  ;;  %v80_v22 = vor.u32 %v78_v59, %v77_v15  ;;  %v1296_v14 = vld [vmem:[%s1670_s2 + $0x70] sm:$0xff] }
  0x13   :  { %356 = vmatpush.bf16.msra.mxu1 %v1261_v25  ;;  %v102_v23 = vrot.slane %v101_v16, 4  ;;  %v107_v24 = vrot.slane %v106_v17, 4  ;;  %v111_v25 = vrot.slane %v109_v18, 5 }
  0x14   :  { %375 = vmatpush.bf16.msra.mxu2 %v1269_v29  ;;  %v72_v26 = vsel %vm1425_vm4, %v1013_v19, %v71_v20  ;;  %v81_v27 = vsel %vm1425_vm4, %v73_v21, %v80_v22  ;;  %v1295_v20 = vld [vmem:[%s1670_s2 + $0x68] sm:$0xff] }
  0x15   :  { %v104_v28 = vsel %vm1434_vm5, %v102_v23, %v103_v7  ;;  %v112_v29 = vsel %vm1434_vm5, %v107_v24, %v111_v25  ;;  %v115_v30 = vunpack.c.l.b16 %v72_v26  ;;  %v116_v31 = vunpack.c.l.b16 %v81_v27  ;;  %457 = vmatpush.bf16.msra.mxu3 %v1278_v37  ;;  %v1294_v24 = vld [vmem:[%s1670_s2 + $0x60] sm:$0xff]  ;;  %v1289_v26 = vld [vmem:[%s1670_s2 + $0x38] sm:$0xff] }
  0x16   :  { %338 = vmatpush.bf16.msra.mxu0 %v1252_v33  ;;  %v135_v32 = vunpack.c.l.b16 %v104_v28  ;;  %v136_v33 = vunpack.c.l.b16 %v112_v29  ;;  %v1293_v28 = vld [vmem:[%s1670_s2 + $0x58] sm:$0xff] }
  0x17   :  { %357 = vmatpush.bf16.msra.mxu1 %v1260_v34  ;;  %v118_v34 = vpack.c.b16 %v116_v31, %v115_v30  ;;  %v1305_v29 = vld [vmem:[%s1670_s2 + $0xb8] sm:$0xff]  ;;  %v1288_v31 = vld [vmem:[%s1670_s2 + $0x30] sm:$0xff] }
  0x18   :  { %376 = vmatpush.bf16.msra.mxu2 %v1268_v40  ;;  %v138_v36 = vpack.c.b16 %v136_v33, %v135_v32  ;;  %v1275_v40 = vld [vmem:[%s1668_s3 + $0x8] sm:$0xff]  ;;  %v1292_v33 = vld [vmem:[%s1670_s2 + $0x50] sm:$0xff] }
  0x19   :  { %458 = vmatpush.bf16.msra.mxu3 %v1277_v38  ;;  %v1291_v38 = vld [vmem:[%s1670_s2 + $0x48] sm:$0xff] }
  0x1a   :  { %339 = vmatpush.bf16.msra.mxu0 %v1251_v49 }
  0x1b   :  { %358 = vmatpush.bf16.msra.mxu1 %v1259_v50 }
  0x1c   :  { %377 = vmatpush.bf16.msra.mxu2 %v1267_v55 }
  0x1d   :  { %459 = vmatpush.bf16.msra.mxu3 %v1276_v39  ;;  %v1303_v39 = vld [vmem:[%s1670_s2 + $0xa8] sm:$0xff] }
  0x1e   :  { %340 = vmatpush.bf16.msra.mxu0 %v1250_v63 }
  0x1f   :  { %359 = vmatpush.bf16.msra.mxu1 %v1258_v0 }
  0x20   :  { %378 = vmatpush.bf16.msra.mxu2 %v1266_v1 }
  0x21   :  { %341 = vmatmul.bf16.vlgmr.msra.gmra.mxu0 %v117_v10  ;;  %460 = vmatpush.bf16.msra.mxu3 %v1275_v40 }
  0x22   :  { %360 = vmatmul.bf16.vlgmr.msra.gmra.mxu1 %v1248_v11  ;;  %839 = vmatpush.bf16.msrb.mxu0 %v1289_v26 }
  0x23   :  { %379 = vmatmul.bf16.vlgmr.msra.gmra.mxu2 %v137_v12  ;;  %858 = vmatpush.bf16.msrb.mxu1 %v1297_v9 }
  0x24   :  { %877 = vmatpush.bf16.msrb.mxu2 %v1305_v29 }
  0x25   :  { %461 = vmatpush.bf16.msra.mxu3 %v1274_v42  ;;  %v1286_v42 = vld [vmem:[%s1670_s2 + $0x20] sm:$0xff] }
  0x26   :  { %840 = vmatpush.bf16.msrb.mxu0 %v1288_v31 }
  0x27   :  { %859 = vmatpush.bf16.msrb.mxu1 %v1296_v14 }
  0x28   :  { %462 = vmatmul.bf16.vlgmr.msra.gmra.mxu3 %v1248_v11 }
  0x29   :  { %1306 = vmatpush.bf16.msrb.mxu3 %v1289_v26 }
  0x2b   :  { %860 = vmatpush.bf16.msrb.mxu1 %v1295_v20 }
  0x2d   :  { %1307 = vmatpush.bf16.msrb.mxu3 %v1288_v31 }
  0x2f   :  { %861 = vmatpush.bf16.msrb.mxu1 %v1294_v24 }
  0x31   :  { %346 = vmatmul.bf16.gmra.mxu0 %v118_v34  ;;  %v1304_v34 = vld [vmem:[%s1670_s2 + $0xb0] sm:$0xff] }
  0x32   :  { %365 = vmatmul.bf16.gmra.mxu1 %v1249_v35  ;;  %878 = vmatpush.bf16.msrb.mxu2 %v1304_v34 }
  0x33   :  { %384 = vmatmul.bf16.gmra.mxu2 %v138_v36  ;;  %862 = vmatpush.bf16.msrb.mxu1 %v1293_v28  ;;  %v1287_v36 = vld [vmem:[%s1670_s2 + $0x28] sm:$0xff] }
  0x34   :  { %841 = vmatpush.bf16.msrb.mxu0 %v1287_v36  ;;  %1308 = vmatpush.bf16.msrb.mxu3 %v1287_v36 }
  0x36   :  { %879 = vmatpush.bf16.msrb.mxu2 %v1303_v39 }
  0x37   :  { %863 = vmatpush.bf16.msrb.mxu1 %v1292_v33 }
  0x38   :  { %467 = vmatmul.bf16.gmra.mxu3 %v1249_v35  ;;  %842 = vmatpush.bf16.msrb.mxu0 %v1286_v42 }
  0x39   :  { %1309 = vmatpush.bf16.msrb.mxu3 %v1286_v42 }
  0x3b   :  { %864 = vmatpush.bf16.msrb.mxu1 %v1291_v38 }
  0x9e   :  { %v342_v43 = vpop.f32.mrf.mxu0 }
  0x9f   :  { %v361_v44 = vpop.f32.mrf.mxu1 }
  0xa0   :  { %v362_v53 = vadd.f32 %v361_v44, %v342_v43  ;;  %v1290_v44 = vld [vmem:[%s1670_s2 + $0x40] sm:$0xff] }
  0xa1   :  { %865 = vmatpush.bf16.msrb.mxu1 %v1290_v44 }
  0xa6   :  { %v380_v45 = vpop.f32.mrf.mxu2  ;;  %v344_v47 = vpop.f32.mrf.mxu0 }
  0xa7   :  { %v363_v48 = vpop.f32.mrf.mxu1  ;;  %v381_v59 = vadd.f32 %v380_v45, %v362_v53  ;;  %v1302_v45 = vld [vmem:[%s1670_s2 + $0xa0] sm:$0xff] }
  0xa8   :  { %v364_v54 = vadd.f32 %v363_v48, %v344_v47  ;;  %v1285_v47 = vld [vmem:[%s1670_s2 + $0x18] sm:$0xff]  ;;  %880 = vmatpush.bf16.msrb.mxu2 %v1302_v45 }
  0xa9   :  { %v1301_v48 = vld [vmem:[%s1670_s2 + $0x98] sm:$0xff]  ;;  %843 = vmatpush.bf16.msrb.mxu0 %v1285_v47  ;;  %1310 = vmatpush.bf16.msrb.mxu3 %v1285_v47 }
  0xac   :  { %881 = vmatpush.bf16.msrb.mxu2 %v1301_v48 }
  0xae   :  { %v382_v49 = vpop.f32.mrf.mxu2  ;;  %v347_v50 = vpop.f32.mrf.mxu0 }
  0xaf   :  { %v366_v51 = vpop.f32.mrf.mxu1  ;;  %v383_v56 = vadd.f32 %v382_v49, %v364_v54  ;;  %v1284_v49 = vld [vmem:[%s1670_s2 + $0x10] sm:$0xff]  ;;  %v1283_v54 = vld [vmem:[%s1670_s2 + $0x8] sm:$0xff] }
  0xb0   :  { %v367_v55 = vadd.f32 %v366_v51, %v347_v50  ;;  %v1324_v50 = vmov 0   ;;  %v1300_v51 = vld [vmem:[%s1670_s2 + $0x90] sm:$0xff]  ;;  %844 = vmatpush.bf16.msrb.mxu0 %v1284_v49  ;;  %1311 = vmatpush.bf16.msrb.mxu3 %v1284_v49 }
  0xb1   :  { %v473_v61 = vadd.f32 %v383_v56, %v381_v59  ;;  %531 = vst [vmem:[#allocation2] sm:$0xf] %v1324_v50  ;;  %882 = vmatpush.bf16.msrb.mxu2 %v1300_v51 }
  0xb2   :  { %532 = vst [vmem:[#allocation2 + $0x10] sm:$0xf] %v1324_v50 }
  0xb3   :  { %533 = vst [vmem:[#allocation2 + $0xc] sm:$0xf] %v1324_v50 }
  0xb4   :  { %534 = vst [vmem:[#allocation2 + $0x1c] sm:$0xf] %v1324_v50  ;;  %845 = vmatpush.bf16.msrb.mxu0 %v1283_v54  ;;  %1312 = vmatpush.bf16.msrb.mxu3 %v1283_v54 }
  0xb6   :  { %v385_v52 = vpop.f32.mrf.mxu2  ;;  %v349_v57 = vpop.f32.mrf.mxu0 }
  0xb7   :  { %v368_v58 = vpop.f32.mrf.mxu1  ;;  %v386_v60 = vadd.f32 %v385_v52, %v367_v55 }
  0xb8   :  { %v369_v62 = vadd.f32 %v368_v58, %v349_v57  ;;  %v1282_v58 = vld [vmem:[%s1670_s2] sm:$0xff] }
  0xb9   :  { %v474_v0 = vadd.f32 %v473_v61, %v386_v60  ;;  %v21_v61 = vld [vmem:[%s1669_s4] sm:$0x1]  ;;  %846 = vmatpush.bf16.msrb.mxu0 %v1282_v58  ;;  %1313 = vmatpush.bf16.msrb.mxu3 %v1282_v58 }
  0xba   :  { %v542_v26 = vld [vmem:[#allocation2 + $0xc] sm:$0xf] }
  0xbb   :  { %v601_v36 = vshll.u32 %v542_v26, 16 }
  0xbe   :  { %v387_v63 = vpop.f32.mrf.mxu2 }
  0xbf   :  { %v388_v1 = vadd.f32 %v387_v63, %v369_v62 }
  0xc1   :  { %v475_v2 = vadd.f32 %v474_v0, %v388_v1 }
  0xc3   :  { %v476_v3 = vrot.slane %v475_v2, 4 }
  0xc5   :  { %v477_v4 = vadd.f32 %v476_v3, %v475_v2  ;;  %v1315_v2 = vld [vmem:[%s1669_s4 + $0x1] ss:$0 sm:$0xff] }
  0xc7   :  { %v478_v5 = vrot.slane %v477_v4, 2 }
  0xc9   :  { %v479_v6 = vadd.f32 %v478_v5, %v477_v4 }
  0xcb   :  { %v480_v7 = vrot.slane %v479_v6, 1 }
  0xcd   :  { %v481_v8 = vadd.f32 %v480_v7, %v479_v6 }
  0xcf   :  { %v482_v10 = vmul.f32 0.03125, %v481_v8 }
  0xd1   :  { %v1511_v11 = vsub.f32 %v381_v59, %v482_v10  ;;  %v1513_v12 = vsub.f32 %v383_v56, %v482_v10  ;;  %v1515_v13 = vsub.f32 %v386_v60, %v482_v10  ;;  %v1520_v15 = vsub.f32 %v388_v1, %v482_v10  ;;  %v1299_v56 = vld [vmem:[%s1670_s2 + $0x88] sm:$0xff]  ;;  %v1298_v60 = vld [vmem:[%s1670_s2 + $0x80] sm:$0xff] }
  0xd2   :  { %883 = vmatpush.bf16.msrb.mxu2 %v1299_v56 }
  0xd3   :  { %v487_v16 = vmul.f32 %v1511_v11, %v1511_v11  ;;  %v488_v17 = vmul.f32 %v1513_v12, %v1513_v12  ;;  %v489_v18 = vmul.f32 %v1515_v13, %v1515_v13  ;;  %v490_v21 = vmul.f32 %v1520_v15, %v1520_v15 }
  0xd5   :  { %v491_v19 = vadd.f32 %v488_v17, %v487_v16 }
  0xd6   :  { %884 = vmatpush.bf16.msrb.mxu2 %v1298_v60 }
  0xd7   :  { %v492_v22 = vadd.f32 %v491_v19, %v489_v18 }
  0xd9   :  { %v493_v23 = vadd.f32 %v492_v22, %v490_v21 }
  0xdb   :  { %v494_v25 = vrot.slane %v493_v23, 4 }
  0xdd   :  { %v495_v27 = vadd.f32 %v494_v25, %v493_v23 }
  0xdf   :  { %v496_v30 = vrot.slane %v495_v27, 2 }
  0xe1   :  { %v497_v32 = vadd.f32 %v496_v30, %v495_v27 }
  0xe3   :  { %v498_v35 = vrot.slane %v497_v32, 1 }
  0xe5   :  { %v499_v37 = vadd.f32 %v498_v35, %v497_v32 }
  0xe7   :  { %v500_v40 = vmul.f32 0.03125, %v499_v37 }
  0xe9   :  { %v501_v43 = vadd.f32 1e-05, %v500_v40 }
  0xeb   :  { %1318 = vrsqrt.f32 %v501_v43  ;;  %vm508_vm7 = vweird.f32 %v501_v43 }
  0xf1   :  { %v1319_v52 = vpop.eup %1318 }
  0xf2   :  { %v503_v53 = vmul.f32 %v1319_v52, %v501_v43  ;;  %vm509_vm6 = vweird.f32 %v1319_v52 }
  0xf3   :  { %vm510_vm8 = vmor %vm508_vm7, %vm509_vm6 }
  0xf4   :  { %v504_v55 = vmul.f32 %v1319_v52, %v503_v53 }
  0xf6   :  { %v505_v57 = vmul.f32 0.5, %v504_v55 }
  0xf8   :  { %v506_v59 = vsub.f32 1.5, %v505_v57 }
  0xfa   :  { %v507_v62 = vmul.f32 %v1319_v52, %v506_v59 }
  0xfc   :  { %v511_v63 = vsel %vm510_vm8, %v1319_v52, %v507_v62 }
  0xfd   :  { %v512_v0 = vmul.f32 %v511_v63, %v21_v61 }
  0xff   :  { %v513_v1 = vperm.slane %v512_v0, 0 }
 0x101   :  { %v516_v3 = vmul.f32 %v513_v1, %v1515_v13  ;;  %v517_v4 = vmul.f32 %v513_v1, %v1520_v15  ;;  %v514_v5 = vmul.f32 %v513_v1, %v1511_v11  ;;  %v515_v6 = vmul.f32 %v513_v1, %v1513_v12  ;;  %v539_v15 = vld [vmem:[#allocation2] sm:$0xf]  ;;  %v543_v11 = vld [vmem:[#allocation2 + $0x10] sm:$0xf] }
 0x102   :  { %v548_v24 = vshrl.u32 %v539_v15, 16  ;;  %v570_v25 = vshrl.u32 %v543_v11, 16 }
 0x103   :  { %v521_v7 = vadd.f32 %v1315_v2, %v516_v3  ;;  %v522_v8 = vadd.f32 %v1315_v2, %v517_v4  ;;  %v519_v9 = vadd.f32 %v1315_v2, %v514_v5  ;;  %v520_v10 = vadd.f32 %v1315_v2, %v515_v6 }
 0x104   :  { %v1150_v28 = vrot.slane %v548_v24, 11  ;;  %v1151_v30 = vrot.slane %v570_v25, 11  ;;  %v603_v3 = vrot.slane %v601_v36, 5 }
 0x105   :  { %v525_v14 = vmax.f32 %v521_v7, 0.0  ;;  %v526_v16 = vmax.f32 %v522_v8, 0.0  ;;  %v523_v17 = vmax.f32 %v519_v9, 0.0  ;;  %v524_v18 = vmax.f32 %v520_v10, 0.0 }
 0x107   :  { %v529_v19 = vpack.c.bf16 %v525_v14, %v525_v14  ;;  %v530_v20 = vpack.c.bf16 %v526_v16, %v526_v16  ;;  %v527_v21 = vpack.c.bf16 %v523_v17, %v523_v17  ;;  %v528_v22 = vpack.c.bf16 %v524_v18, %v524_v18 }
 0x109   :  { %537 = vst [vmem:[#allocation2 + $0x14] sm:$0xf] %v529_v19  ;;  %v631_v13 = vunpack.c.l.b16 %v527_v21  ;;  %v632_v23 = vunpack.c.l.b16 %v528_v22  ;;  %v633_v34 = vunpack.c.l.b16 %v529_v19  ;;  %v634_v35 = vunpack.c.l.b16 %v530_v20 }
 0x10a   :  { %538 = vst [vmem:[#allocation2 + $0x18] sm:$0xf] %v530_v20 }
 0x10b   :  { %535 = vst [vmem:[#allocation2 + $0x4] sm:$0xf] %v527_v21  ;;  %v635_v12 = vpack.c.b16 %v632_v23, %v631_v13  ;;  %v636_v9 = vpack.c.b16 %v634_v35, %v633_v34  ;;  %v546_v13 = vld [vmem:[#allocation2 + $0x1c] sm:$0xf] }
 0x10c   :  { %536 = vst [vmem:[#allocation2 + $0x8] sm:$0xf] %v528_v22 }
 0x10d   :  { %866 = vmatmul.bf16.vlgmr.msrb.gmra.mxu1 %v635_v12  ;;  %v615_v12 = vshll.u32 %v546_v13, 16 }
 0x10f   :  { %v617_v26 = vrot.slane %v615_v12, 5 }
 0x110   :  { %v544_v27 = vld [vmem:[#allocation2 + $0x14] sm:$0xf] }
 0x111   :  { %v545_v29 = vld [vmem:[#allocation2 + $0x18] sm:$0xf]  ;;  %v575_v31 = vshrl.u32 %v544_v27, 16  ;;  %v578_v42 = vshll.u32 %v544_v27, 16 }
 0x112   :  { %v540_v32 = vld [vmem:[#allocation2 + $0x4] sm:$0xf]  ;;  %v584_v33 = vshrl.u32 %v545_v29, 16  ;;  %v587_v47 = vshll.u32 %v545_v29, 16 }
 0x113   :  { %v541_v37 = vld [vmem:[#allocation2 + $0x8] sm:$0xf]  ;;  %v553_v38 = vshrl.u32 %v540_v32, 16  ;;  %v556_v39 = vshll.u32 %v540_v32, 16  ;;  %v577_v40 = vrot.slane %v575_v31, 7  ;;  %v605_v16 = vrot.slane %v575_v31, 4  ;;  %v463_v32 = vpop.f32.mrf.mxu3 }
 0x114   :  { %v562_v43 = vshrl.u32 %v541_v37, 16  ;;  %v565_v44 = vshll.u32 %v541_v37, 16  ;;  %v586_v45 = vrot.slane %v584_v33, 7  ;;  %v606_v17 = vrot.slane %v578_v42, 5 }
 0x115   :  { %v555_v48 = vrot.slane %v553_v38, 7  ;;  %v580_v49 = vor.u32 %v578_v42, %v577_v40  ;;  %v582_v50 = vrot.slane %v577_v40, 4  ;;  %v591_v51 = vrot.slane %v553_v38, 4 }
 0x116   :  { %v564_v52 = vrot.slane %v562_v43, 7  ;;  %v589_v53 = vor.u32 %v587_v47, %v586_v45  ;;  %v592_v54 = vrot.slane %v556_v39, 5  ;;  %v595_v55 = vrot.slane %v565_v44, 5 }
 0x117   :  { %v558_v56 = vor.u32 %v556_v39, %v555_v48  ;;  %v560_v57 = vrot.slane %v555_v48, 4  ;;  %v581_v58 = vsel %vm1425_vm4, %v1151_v30, %v580_v49  ;;  %v597_v59 = vrot.slane %v562_v43, 4 }
 0x118   :  { %v567_v60 = vor.u32 %v565_v44, %v564_v52  ;;  %v590_v61 = vsel %vm1425_vm4, %v582_v50, %v589_v53  ;;  %v621_v62 = vunpack.c.l.b16 %v581_v58  ;;  %v593_v63 = vor.u32 %v592_v54, %v591_v51 }
 0x119   :  { %v559_v0 = vsel %vm1425_vm4, %v1150_v28, %v558_v56  ;;  %v622_v1 = vunpack.c.l.b16 %v590_v61  ;;  %v598_v2 = vor.u32 %v597_v59, %v595_v55  ;;  %v609_v18 = vrot.slane %v587_v47, 5 }
 0x11a   :  { %v568_v4 = vsel %vm1425_vm4, %v560_v57, %v567_v60  ;;  %v619_v5 = vunpack.c.l.b16 %v559_v0  ;;  %v594_v6 = vrot.slane %v593_v63, 4  ;;  %v611_v21 = vrot.slane %v584_v33, 4 }
 0x11b   :  { %v620_v7 = vunpack.c.l.b16 %v568_v4  ;;  %v624_v8 = vpack.c.b16 %v622_v1, %v621_v62  ;;  %v599_v10 = vrot.slane %v598_v2, 4  ;;  %v607_v15 = vor.u32 %v606_v17, %v605_v16  ;;  %v465_v33 = vpop.f32.mrf.mxu3 }
 0x11c   :  { %v596_v14 = vsel %vm1434_vm5, %v594_v6, %v595_v55  ;;  %v612_v11 = vor.u32 %v611_v21, %v609_v18  ;;  %v946_v35 = vadd.f32 %v465_v33, %v463_v32 }
 0x11d   :  { %v623_v19 = vpack.c.b16 %v620_v7, %v619_v5  ;;  %852 = vmatmul.bf16.vlgmr.msrb.gmra.mxu3 %v624_v8  ;;  %871 = vmatmul.bf16.gmra.mxu1 %v636_v9  ;;  %v604_v20 = vsel %vm1434_vm5, %v599_v10, %v603_v3  ;;  %v639_v41 = vunpack.c.l.b16 %v596_v14  ;;  %v608_v24 = vrot.slane %v607_v15, 4 }
 0x11e   :  { %v640_v22 = vunpack.c.l.b16 %v604_v20  ;;  %v613_v25 = vrot.slane %v612_v11, 4 }
 0x11f   :  { %847 = vmatmul.bf16.vlgmr.msrb.gmra.mxu0 %v623_v19  ;;  %v610_v27 = vsel %vm1434_vm5, %v608_v24, %v609_v18 }
 0x120   :  { %v643_v23 = vpack.c.b16 %v640_v22, %v639_v41  ;;  %v618_v28 = vsel %vm1434_vm5, %v613_v25, %v617_v26  ;;  %v641_v29 = vunpack.c.l.b16 %v610_v27 }
 0x121   :  { %v642_v30 = vunpack.c.l.b16 %v618_v28 }
 0x122   :  { %885 = vmatmul.bf16.vlgmr.msrb.gmra.mxu2 %v643_v23 }
 0x123   :  { %v644_v31 = vpack.c.b16 %v642_v30, %v641_v29  ;;  %v468_v34 = vpop.f32.mrf.mxu3 }
 0x124   :  { %v947_v36 = vadd.f32 %v946_v35, %v468_v34 }
 0x12b   :  { %v470_v37 = vpop.f32.mrf.mxu3 }
 0x12c   :  { %v948_v38 = vadd.f32 %v947_v36, %v470_v37 }
 0x12e   :  { %v949_v39 = vrot.slane %v948_v38, 4 }
 0x130   :  { %v950_v40 = vadd.f32 %v949_v39, %v948_v38 }
 0x132   :  { %890 = vmatmul.bf16.gmra.mxu2 %v644_v31  ;;  %v951_v42 = vrot.slane %v950_v40, 2 }
 0x134   :  { %v952_v43 = vadd.f32 %v951_v42, %v950_v40 }
 0x136   :  { %v953_v44 = vrot.slane %v952_v43, 1 }
 0x138   :  { %v954_v45 = vadd.f32 %v953_v44, %v952_v43 }
 0x13a   :  { %v955_v47 = vmul.f32 0.03125, %v954_v45 }
 0x13c   :  { %v1622_v48 = vsub.f32 %v463_v32, %v955_v47  ;;  %v1624_v49 = vsub.f32 %v465_v33, %v955_v47  ;;  %v1626_v50 = vsub.f32 %v468_v34, %v955_v47  ;;  %v1632_v55 = vsub.f32 %v470_v37, %v955_v47 }
 0x13e   :  { %v960_v51 = vmul.f32 %v1622_v48, %v1622_v48  ;;  %v961_v52 = vmul.f32 %v1624_v49, %v1624_v49  ;;  %v962_v56 = vmul.f32 %v1626_v50, %v1626_v50  ;;  %v963_v59 = vmul.f32 %v1632_v55, %v1632_v55 }
 0x140   :  { %v964_v57 = vadd.f32 %v961_v52, %v960_v51 }
 0x142   :  { %v965_v60 = vadd.f32 %v964_v57, %v962_v56 }
 0x144   :  { %v966_v63 = vadd.f32 %v965_v60, %v963_v59 }
 0x146   :  { %v967_v2 = vrot.slane %v966_v63, 4 }
 0x148   :  { %v968_v8 = vadd.f32 %v967_v2, %v966_v63  ;;  %v25_v63 = vld [vmem:[%s1669_s4 + $0x4] sm:$0x1] }
 0x14a   :  { %v969_v19 = vrot.slane %v968_v8, 2 }
 0x14c   :  { %v970_v13 = vadd.f32 %v969_v19, %v968_v8 }
 0x14e   :  { %v971_v11 = vrot.slane %v970_v13, 1 }
 0x150   :  { %v972_v25 = vadd.f32 %v971_v11, %v970_v13 }
 0x152   :  { %v973_v28 = vmul.f32 0.03125, %v972_v25 }
 0x154   :  { %v974_v33 = vadd.f32 1e-05, %v973_v28 }
 0x156   :  { %1320 = vrsqrt.f32 %v974_v33  ;;  %vm981_vm9 = vweird.f32 %v974_v33 }
 0x15c   :  { %v1321_v44 = vpop.eup %1320 }
 0x15d   :  { %v976_v47 = vmul.f32 %v1321_v44, %v974_v33  ;;  %vm982_vm10 = vweird.f32 %v1321_v44 }
 0x15e   :  { %vm983_vm11 = vmor %vm981_vm9, %vm982_vm10 }
 0x15f   :  { %v977_v52 = vmul.f32 %v1321_v44, %v976_v47 }
 0x161   :  { %v978_v56 = vmul.f32 0.5, %v977_v52 }
 0x163   :  { %v979_v59 = vsub.f32 1.5, %v978_v56 }
 0x165   :  { %v980_v60 = vmul.f32 %v1321_v44, %v979_v59 }
 0x18a   :  { %v867_v46 = vpop.f32.mrf.mxu1 }
 0x192   :  { %v869_v54 = vpop.f32.mrf.mxu1 }
 0x19a   :  { %v872_v0 = vpop.f32.mrf.mxu1 }
 0x19c   :  { %v848_v58 = vpop.f32.mrf.mxu0 }
 0x19d   :  { %v868_v5 = vadd.f32 %v867_v46, %v848_v58 }
 0x1a0   :  { %v853_v62 = vpop.f32.mrf.mxu3 }
 0x1a1   :  { %v873_v6 = vadd.f32 %v872_v0, %v853_v62  ;;  %v984_v0 = vsel %vm983_vm11, %v1321_v44, %v980_v60 }
 0x1a2   :  { %v874_v16 = vpop.f32.mrf.mxu1  ;;  %v985_v2 = vmul.f32 %v984_v0, %v25_v63 }
 0x1a4   :  { %v850_v1 = vpop.f32.mrf.mxu0 }
 0x1a5   :  { %v886_v53 = vpop.f32.mrf.mxu2  ;;  %v870_v4 = vadd.f32 %v869_v54, %v850_v1 }
 0x1a6   :  { %v887_v10 = vadd.f32 %v886_v53, %v868_v5  ;;  %v986_v5 = vperm.slane %v985_v2, 0 }
 0x1a8   :  { %v855_v9 = vpop.f32.mrf.mxu3 }
 0x1a9   :  { %v875_v17 = vadd.f32 %v874_v16, %v855_v9  ;;  %v989_v16 = vmul.f32 %v986_v5, %v1626_v50 }
 0x1ad   :  { %v888_v61 = vpop.f32.mrf.mxu2 }
 0x1ae   :  { %v889_v7 = vadd.f32 %v888_v61, %v870_v4 }
 0x1b0   :  { %v896_v18 = vadd.f32 %v889_v7, %v887_v10 }
 0x1b5   :  { %v891_v3 = vpop.f32.mrf.mxu2 }
 0x1b6   :  { %v892_v14 = vadd.f32 %v891_v3, %v873_v6  ;;  %v23_v6 = vld [vmem:[%s1669_s4 + $0x2] sm:$0x1] }
 0x1b8   :  { %v897_v41 = vadd.f32 %v896_v18, %v892_v14  ;;  %v1316_v18 = vld [vmem:[%s1669_s4 + $0x5] ss:$0 sm:$0xff] }
 0x1bd   :  { %v893_v20 = vpop.f32.mrf.mxu2 }
 0x1be   :  { %v894_v21 = vadd.f32 %v893_v20, %v875_v17  ;;  %v990_v17 = vmul.f32 %v986_v5, %v1632_v55  ;;  %v1317_v20 = vld [vmem:[%s1669_s4 + $0x3] ss:$0 sm:$0xff] }
 0x1c0   :  { %v898_v22 = vadd.f32 %v897_v41, %v894_v21 }
 0x1c2   :  { %v899_v23 = vrot.slane %v898_v22, 4 }
 0x1c4   :  { %v900_v15 = vadd.f32 %v899_v23, %v898_v22 }
 0x1c6   :  { %v901_v12 = vrot.slane %v900_v15, 2 }
 0x1c8   :  { %v902_v24 = vadd.f32 %v901_v12, %v900_v15  ;;  %v995_v15 = vadd.f32 %v1316_v18, %v990_v17 }
 0x1ca   :  { %v903_v26 = vrot.slane %v902_v24, 1 }
 0x1cc   :  { %v904_v27 = vadd.f32 %v903_v26, %v902_v24 }
 0x1ce   :  { %v905_v29 = vmul.f32 0.03125, %v904_v27 }
 0x1d0   :  { %v906_v30 = vsub.f32 %v887_v10, %v905_v29  ;;  %v907_v31 = vsub.f32 %v889_v7, %v905_v29  ;;  %v908_v32 = vsub.f32 %v892_v14, %v905_v29  ;;  %v909_v34 = vsub.f32 %v894_v21, %v905_v29 }
 0x1d1   :  { %v987_v10 = vmul.f32 %v986_v5, %v1622_v48  ;;  %v988_v14 = vmul.f32 %v986_v5, %v1624_v49  ;;  %v994_v49 = vadd.f32 %v1316_v18, %v989_v16 }
 0x1d2   :  { %v910_v35 = vmul.f32 %v906_v30, %v906_v30  ;;  %v911_v36 = vmul.f32 %v907_v31, %v907_v31  ;;  %v912_v37 = vmul.f32 %v908_v32, %v908_v32  ;;  %v913_v39 = vmul.f32 %v909_v34, %v909_v34 }
 0x1d3   :  { %v992_v48 = vadd.f32 %v1316_v18, %v987_v10  ;;  %v993_v23 = vadd.f32 %v1316_v18, %v988_v14 }
 0x1d4   :  { %v914_v38 = vadd.f32 %v911_v36, %v910_v35 }
 0x1d6   :  { %v915_v40 = vadd.f32 %v914_v38, %v912_v37 }
 0x1d8   :  { %v916_v42 = vadd.f32 %v915_v40, %v913_v39 }
 0x1da   :  { %v917_v43 = vrot.slane %v916_v42, 4 }
 0x1dc   :  { %v918_v45 = vadd.f32 %v917_v43, %v916_v42 }
 0x1de   :  { %v919_v46 = vrot.slane %v918_v45, 2 }
 0x1e0   :  { %v920_v51 = vadd.f32 %v919_v46, %v918_v45 }
 0x1e2   :  { %v921_v53 = vrot.slane %v920_v51, 1 }
 0x1e4   :  { %v922_v54 = vadd.f32 %v921_v53, %v920_v51 }
 0x1e6   :  { %v923_v57 = vmul.f32 0.03125, %v922_v54 }
 0x1e8   :  { %v924_v58 = vadd.f32 1e-05, %v923_v57 }
 0x1ea   :  { %1322 = vrsqrt.f32 %v924_v58  ;;  %vm931_vm13 = vweird.f32 %v924_v58 }
 0x1f0   :  { %v1323_v61 = vpop.eup %1322 }
 0x1f1   :  { %v926_v62 = vmul.f32 %v1323_v61, %v924_v58  ;;  %vm932_vm12 = vweird.f32 %v1323_v61 }
 0x1f2   :  { %vm933_vm14 = vmor %vm931_vm13, %vm932_vm12 }
 0x1f3   :  { %v927_v1 = vmul.f32 %v1323_v61, %v926_v62 }
 0x1f5   :  { %v928_v3 = vmul.f32 0.5, %v927_v1 }
 0x1f7   :  { %v929_v4 = vsub.f32 1.5, %v928_v3 }
 0x1f9   :  { %v930_v7 = vmul.f32 %v1323_v61, %v929_v4 }
 0x1fb   :  { %v934_v8 = vsel %vm933_vm14, %v1323_v61, %v930_v7 }
 0x1fc   :  { %v935_v9 = vmul.f32 %v934_v8, %v23_v6 }
 0x1fe   :  { %v936_v19 = vperm.slane %v935_v9, 0 }
 0x200   :  { %v937_v41 = vmul.f32 %v936_v19, %v906_v30  ;;  %v938_v21 = vmul.f32 %v936_v19, %v907_v31  ;;  %v939_v22 = vmul.f32 %v936_v19, %v908_v32  ;;  %v940_v13 = vmul.f32 %v936_v19, %v909_v34 }
 0x202   :  { %v942_v50 = vadd.f32 %v1317_v20, %v937_v41  ;;  %v943_v11 = vadd.f32 %v1317_v20, %v938_v21  ;;  %v944_v55 = vadd.f32 %v1317_v20, %v939_v22  ;;  %v945_v12 = vadd.f32 %v1317_v20, %v940_v13 }
 0x204   :  { %v996_v24 = vadd.f32 %v992_v48, %v942_v50  ;;  %v997_v25 = vadd.f32 %v993_v23, %v943_v11  ;;  %v998_v26 = vadd.f32 %v994_v49, %v944_v55  ;;  %v999_v27 = vadd.f32 %v995_v15, %v945_v12 }
 0x206   :  { %v1000_v28 = vmax.f32 %v996_v24, 0.0  ;;  %v1001_v29 = vmax.f32 %v997_v25, 0.0  ;;  %v1002_v33 = vmax.f32 %v998_v26, 0.0  ;;  %v1003_v35 = vmax.f32 %v999_v27, 0.0 }
 0x208   :  { %1004 = vst [vmem:[%s1671_s5] sm:$0xff] %v1000_v28 }
 0x209   :  { %1005 = vst [vmem:[%s1671_s5 + $0x8] sm:$0xff] %v1001_v29 }
 0x20a   :  { %1006 = vst [vmem:[%s1671_s5 + $0x10] sm:$0xff] %v1002_v33 }
 0x20b   :  { %1007 = vst [vmem:[%s1671_s5 + $0x18] sm:$0xff] %v1003_v35 }

</bundles_post_ra>
